<compile_context>
chip_gen: v7x
topology: tpu7x:2x2x1
jax: 0.10.0
libtpu: 0.0.40
codegen_flags: <defaults>
</compile_context>

<pallas_src>
import jax
import jax.numpy as jnp
from jax.experimental import pallas as pl
from jax.experimental.pallas import tpu as pltpu

EPS = 1e-5  # nn.LayerNorm default
LANE = 128


def _layernorm_nchw_kernel(x_ref, g_ref, b_ref, o_ref):
    # x_ref: (tile_n, C, tile_s) in the input dtype.
    # g_ref/b_ref: (1, C, 1) float32 affine params (broadcast in-kernel).
    x = x_ref[...]
    c = x.shape[1]
    inv_c = jnp.float32(1.0 / c)

    # Fused single pass over the channel (sublane) axis, accumulated in f32.
    s1 = jnp.sum(x, axis=1, keepdims=True, dtype=jnp.float32)   # (tile_n, 1, tile_s)
    xf = x.astype(jnp.float32)
    s2 = jnp.sum(xf * xf, axis=1, keepdims=True)                # (tile_n, 1, tile_s)

    mean = s1 * inv_c
    var = s2 * inv_c - mean * mean          # biased variance (PyTorch LayerNorm)
    var = jnp.maximum(var, 0.0)             # guard fp cancellation -> no NaN
    inv = jax.lax.rsqrt(var + EPS)

    y = (xf - mean) * inv
    o_ref[...] = (y * g_ref[...] + b_ref[...]).astype(o_ref.dtype)


def _round_up(a, b):
    return (a + b - 1) // b * b


def _cdiv(a, b):
    return (a + b - 1) // b


def _largest_divisor_leq(n, cap):
    for d in range(min(n, cap), 0, -1):
        if n % d == 0:
            return d
    return 1


def _tpu_core_count():
    # v7x has 2 TensorCores per chip; v5e/v6e have 1.
    try:
        kind = jax.devices()[0].device_kind.lower()
    except Exception:
        return 1
    return 2 if "v7" in kind else 1


def layer_normalization_forward(x_nchw, gamma, beta):
    """Equivalent of LayerNormalization.forward: NCHW in, NCHW out."""
    N, C, H, W = x_nchw.shape
    S = H * W
    x3 = x_nchw.reshape(N, C, S)  # metadata-only reshape, no copy

    in_item = x3.dtype.itemsize
    # Sublane pack (f32: 8, bf16: 16, int8: 32) -> real VMEM footprint of C.
    pack = {4: 8, 2: 16, 1: 32}.get(in_item, 8)
    C_pad = _round_up(C, pack)

    # --- Tile selection: grow the lane-dense spatial tile first (contiguous
    # HBM runs of tile_s * itemsize bytes), targeting ~2 MiB input blocks,
    # then grow the batch tile only if the whole spatial extent already fits.
    TARGET_BLOCK_BYTES = 2 * 1024 * 1024
    max_lane_tiles = max(1, TARGET_BLOCK_BYTES // (C_pad * LANE * in_item))
    tile_s = min(_cdiv(S, LANE), max_lane_tiles) * LANE

    tile_n = 1
    if tile_s >= _round_up(S, LANE):  # whole S in one block -> spend budget on N
        per_n_bytes = C_pad * tile_s * in_item
        tile_n = _largest_divisor_leq(N, max(1, TARGET_BLOCK_BYTES // per_n_bytes))

    # --- v7x only: keep >= 4 evenly sized parallel steps so both TensorCores
    # get work (no-op on single-core v5e/v6e).
    if _tpu_core_count() > 1:
        while (N // tile_n) * _cdiv(S, tile_s) < 4 and tile_s >= 2 * 512:
            tile_s = _round_up(tile_s // 2, LANE)
        while (N // tile_n) * _cdiv(S, tile_s) < 4 and tile_n > 1:
            tile_n = _largest_divisor_leq(N, max(1, tile_n // 2))

    # Partial edge block along S is handled (masked) by Pallas; no padding,
    # no post-slice, no extra HBM passes.
    grid = (N // tile_n, _cdiv(S, tile_s))

    g3 = gamma.reshape(1, C, 1).astype(jnp.float32)
    b3 = beta.reshape(1, C, 1).astype(jnp.float32)

    # VMEM budget: double-buffered in/out blocks + f32 temporaries (with C
    # sublane-padded), capped at 32 MiB -> fits v7x's 64 MiB/TC with headroom.
    in_block = tile_n * C_pad * tile_s * in_item
    out_block = in_block
    f32_block = tile_n * C_pad * tile_s * 4
    vmem_limit = min(
        32 * 1024 * 1024,
        max(8 * 1024 * 1024, 2 * in_block + 2 * out_block + 6 * f32_block + (2 << 20)),
    )

    y3 = pl.pallas_call(
        _layernorm_nchw_kernel,
        out_shape=jax.ShapeDtypeStruct((N, C, S), x_nchw.dtype),
        grid_spec=pltpu.PrefetchScalarGridSpec(
            num_scalar_prefetch=0,
            grid=grid,
            in_specs=[
                pl.BlockSpec((tile_n, C, tile_s), lambda n, s: (n, 0, s)),
                pl.BlockSpec((1, C, 1), lambda n, s: (0, 0, 0)),
                pl.BlockSpec((1, C, 1), lambda n, s: (0, 0, 0)),
            ],
            out_specs=pl.BlockSpec((tile_n, C, tile_s), lambda n, s: (n, 0, s)),
        ),
        compiler_params=pltpu.CompilerParams(
            dimension_semantics=("parallel", "parallel"),
            vmem_limit_bytes=int(vmem_limit),
        ),
    )(x3, g3, b3)

    return y3.reshape(N, C, H, W)  # metadata-only reshape, no copy


def _reference(x_nchw, gamma, beta):
    xf = x_nchw.astype(jnp.float32)
    mean = jnp.mean(xf, axis=1, keepdims=True)
    var = jnp.mean((xf - mean) ** 2, axis=1, keepdims=True)
    y = (xf - mean) / jnp.sqrt(var + EPS)
    y = y * gamma.reshape(1, -1, 1, 1) + beta.reshape(1, -1, 1, 1)
    return y.astype(x_nchw.dtype)


if __name__ == "__main__":
    key = jax.random.PRNGKey(0)
    kx, kg, kb = jax.random.split(key, 3)

    N, C, H, W = 2, 4, 16, 16
    x = jax.random.normal(kx, (N, C, H, W), dtype=jnp.float32)
    # nn.LayerNorm defaults to gamma=1, beta=0; perturb so the affine matters.
    gamma = 1.0 + 0.1 * jax.random.normal(kg, (C,), dtype=jnp.float32)
    beta = 0.1 * jax.random.normal(kb, (C,), dtype=jnp.float32)

    out = layer_normalization_forward(x, gamma, beta)
    out = jax.block_until_ready(out)

    ref = _reference(x, gamma, beta)
    assert out.shape == (N, C, H, W)
    assert jnp.allclose(out, ref, atol=1e-4, rtol=1e-4)
    print("KERNEL_OK")
</pallas_src>

<mosaic_0001>
module attributes {stable_mosaic.version = 11 : i64} {
  func.func @_layernorm_nchw_kernel(%arg0: i32, %arg1: i32, %arg2: memref<2x4x256xf32, #tpu.memory_space<vmem>>, %arg3: memref<1x4x1xf32, #tpu.memory_space<vmem>>, %arg4: memref<1x4x1xf32, #tpu.memory_space<vmem>>, %arg5: memref<2x4x256xf32, #tpu.memory_space<vmem>>) attributes {dimension_semantics = [#tpu.dimension_semantics<parallel>, #tpu.dimension_semantics<parallel>], iteration_bounds = array<i64: 1, 1>, scalar_prefetch = 0 : i64, scratch_operands = 0 : i64, tpu.core_type = #tpu.core_type<tc>, window_params = [{transform_indices = @transform_0, window_bounds = array<i64: 2, 4, 256>}, {pipeline_mode = #tpu.pipeline_mode<synchronous>, transform_indices = @transform_1, window_bounds = array<i64: 1, 4, 1>}, {pipeline_mode = #tpu.pipeline_mode<synchronous>, transform_indices = @transform_2, window_bounds = array<i64: 1, 4, 1>}, {transform_indices = @transform_3, window_bounds = array<i64: 2, 4, 256>}]} {
    %c0 = arith.constant 0 : index
    %c0_0 = arith.constant 0 : index
    %c0_1 = arith.constant 0 : index
    %0 = vector.load %arg2[%c0, %c0_0, %c0_1] : memref<2x4x256xf32, #tpu.memory_space<vmem>>, vector<2x4x256xf32>
    %cst = arith.constant dense<0.000000e+00> : vector<2x256xf32>
    %1 = vector.multi_reduction <add>, %0, %cst [1] : vector<2x4x256xf32> to vector<2x256xf32>
    %2 = vector.shape_cast %1 : vector<2x256xf32> to vector<2x1x256xf32>
    %3 = arith.mulf %0, %0 : vector<2x4x256xf32>
    %cst_2 = arith.constant dense<0.000000e+00> : vector<2x256xf32>
    %4 = vector.multi_reduction <add>, %3, %cst_2 [1] : vector<2x4x256xf32> to vector<2x256xf32>
    %5 = vector.shape_cast %4 : vector<2x256xf32> to vector<2x1x256xf32>
    %cst_3 = arith.constant 2.500000e-01 : f32
    %6 = vector.broadcast %cst_3 : f32 to vector<2x1x256xf32>
    %7 = arith.mulf %2, %6 : vector<2x1x256xf32>
    %cst_4 = arith.constant 2.500000e-01 : f32
    %8 = vector.broadcast %cst_4 : f32 to vector<2x1x256xf32>
    %9 = arith.mulf %5, %8 : vector<2x1x256xf32>
    %10 = arith.mulf %7, %7 : vector<2x1x256xf32>
    %11 = arith.subf %9, %10 : vector<2x1x256xf32>
    %cst_5 = arith.constant 0.000000e+00 : f32
    %12 = vector.broadcast %cst_5 : f32 to vector<2x1x256xf32>
    %13 = arith.maximumf %11, %12 : vector<2x1x256xf32>
    %cst_6 = arith.constant 9.99999974E-6 : f32
    %14 = vector.broadcast %cst_6 : f32 to vector<2x1x256xf32>
    %15 = arith.addf %13, %14 : vector<2x1x256xf32>
    %16 = math.rsqrt %15 : vector<2x1x256xf32>
    %17 = vector.broadcast %7 : vector<2x1x256xf32> to vector<2x4x256xf32>
    %18 = arith.subf %0, %17 : vector<2x4x256xf32>
    %19 = vector.broadcast %16 : vector<2x1x256xf32> to vector<2x4x256xf32>
    %20 = arith.mulf %18, %19 : vector<2x4x256xf32>
    %c0_7 = arith.constant 0 : index
    %c0_8 = arith.constant 0 : index
    %c0_9 = arith.constant 0 : index
    %21 = vector.load %arg3[%c0_7, %c0_8, %c0_9] : memref<1x4x1xf32, #tpu.memory_space<vmem>>, vector<1x4x1xf32>
    %22 = vector.broadcast %21 : vector<1x4x1xf32> to vector<2x4x256xf32>
    %23 = arith.mulf %20, %22 : vector<2x4x256xf32>
    %c0_10 = arith.constant 0 : index
    %c0_11 = arith.constant 0 : index
    %c0_12 = arith.constant 0 : index
    %24 = vector.load %arg4[%c0_10, %c0_11, %c0_12] : memref<1x4x1xf32, #tpu.memory_space<vmem>>, vector<1x4x1xf32>
    %25 = vector.broadcast %24 : vector<1x4x1xf32> to vector<2x4x256xf32>
    %26 = arith.addf %23, %25 : vector<2x4x256xf32>
    %c0_13 = arith.constant 0 : index
    %c0_14 = arith.constant 0 : index
    %c0_15 = arith.constant 0 : index
    %27 = vector.load %arg5[%c0_13, %c0_14, %c0_15] : memref<2x4x256xf32, #tpu.memory_space<vmem>>, vector<2x4x256xf32>
    tpu.vector_store %arg5[%c0_13, %c0_14, %c0_15], %26 {strides = array<i32>} : memref<2x4x256xf32, #tpu.memory_space<vmem>>, vector<2x4x256xf32>,
    return
  }
  func.func @transform_0(%arg0: i32, %arg1: i32) -> (i32, i32, i32) {
    %c0_i32 = arith.constant 0 : i32
    %c0_i32_0 = arith.constant 0 : i32
    return %arg0, %c0_i32, %arg1 : i32, i32, i32
  }
  func.func @transform_1(%arg0: i32, %arg1: i32) -> (i32, i32, i32) {
    %c0_i32 = arith.constant 0 : i32
    %c0_i32_0 = arith.constant 0 : i32
    %c0_i32_1 = arith.constant 0 : i32
    %c0_i32_2 = arith.constant 0 : i32
    return %c0_i32, %c0_i32_0, %c0_i32_1 : i32, i32, i32
  }
  func.func @transform_2(%arg0: i32, %arg1: i32) -> (i32, i32, i32) {
    %c0_i32 = arith.constant 0 : i32
    %c0_i32_0 = arith.constant 0 : i32
    %c0_i32_1 = arith.constant 0 : i32
    %c0_i32_2 = arith.constant 0 : i32
    return %c0_i32, %c0_i32_0, %c0_i32_1 : i32, i32, i32
  }
  func.func @transform_3(%arg0: i32, %arg1: i32) -> (i32, i32, i32) {
    %c0_i32 = arith.constant 0 : i32
    %c0_i32_0 = arith.constant 0 : i32
    return %arg0, %c0_i32, %arg1 : i32, i32, i32
  }
}

</mosaic_0001>

<bundles_post_ra>
// kernel: tpu_custom_call.1
= control target key start
LH: loop header
LB: loop body
LE: loop exit
PB: predicated region body
PF: predicated region fallthrough
CT: control target
= control target key end

     0   :  { %8 = vsyncpa [#allocation3], 0  ;;  %s350_s0 = inlined_call_operand.hbm [shape: f32[2,4,256], index: 0, kind: input, shape index: {}]   ;;  %s351_s1 = inlined_call_operand.vmem [shape: f32[1,4,1], index: 1, kind: input, shape index: {}]   ;;  %s352_s2 = inlined_call_operand.vmem [shape: f32[1,4,1], index: 2, kind: input, shape index: {}]   ;;  %s353_s3 = inlined_call_operand.hbm [shape: f32[2,4,256], index: 3, kind: output, shape index: {}]  }
   0x1   :  { %9 = vsyncpa [#allocation4], 0  ;;  %s264_s12 = smov [#allocation2]   ;;  %s216_s16 = scalar_lea.hbm %s350_s0, 256 }
   0x2   :  { %s15_s13 = sshll.u32 %s264_s12, 4  ;;  %p217_p0 = scmp.ne.s32.totalorder %s350_s0, %s216_s16  ;;  %s16_s13 = int_to_ptr.vmem [resolvable:$true] %s15_s13 }
   0x3   :  { %p220_p1 = scmp.lt.u32.totalorder %s216_s16, %s350_s0 }
   0x5   :  { %p222_p2 = pnand %p220_p1, %p217_p0 }
   0x7   :  { %225 = shalt.err (!%p222_p2)
}
   0x8   :  { %s226_s21 = scalar_lea.vmem %s16_s13, 256  ;;  %p231_p4 = scmp.lt.s32.totalorder %s16_s13, %s16_s13 }
   0x9   :  { %p227_p3 = scmp.ne.s32.totalorder %s16_s13, %s226_s21  ;;  %p232_p5 = scmp.lt.s32.totalorder %s226_s21, %s226_s21 }
   0xb   :  { %p233_p6 = por %p232_p5, %p231_p4 }
   0xd   :  { %p234_p7 = pnand %p233_p6, %p227_p3 }
   0xf   :  { %237 = shalt.err (!%p234_p7)
}
  0x10   :  { %s265_s22 = smov 128   ;;  %s266_s23 = smov 8  }
  0x11   :  { %21 = dma.hbm_to_vmem [thread:$0]  %s350_s0, 256, %s16_s13, [#allocation3], %s265_s22, %s265_s22, %s266_s23  }
  0x12   :  { %260 = dma.done.wait [#allocation3], 256  }
  0x13   :  { %261 = vsyncadd [#allocation3], 4294967040  ;;  %v267_v0 = vmov 0   ;;  %v150_v1 = vld [vmem:[%s351_s1] sm:$0xf]  ;;  %v313_v4 = vld [vmem:[#allocation2 + $0x8] sm:$0xff] }
  0x14   :  { %205 = vset.pattern.permute.xlu0 %v267_v0  ;;  %v165_v2 = vld [vmem:[%s352_s2] sm:$0xf]  ;;  %vm37_vm0 = vcmask 1043456   ;;  %v34_v7 = vcombine.high %v313_v4, %v313_v4  ;;  %v67_v8 = vmul.f32 %v313_v4, %v313_v4  ;;  %s269_s0 = smov [#allocation5]  }
  0x15   :  { %153 = vperm.xlu0 %205, %v150_v1   ;;  %v311_v3 = vld [vmem:[#allocation2] sm:$0xff]  ;;  %v52_v12 = vsel %vm37_vm0, %v313_v4, 0.0  ;;  %s187_s1 = sshll.u32 %s269_s0, 4  ;;  %s188_s1 = int_to_ptr.vmem [resolvable:$true] %s187_s1 }
  0x16   :  { %v33_v5 = vcombine.high %v311_v3, %v311_v3  ;;  %v66_v6 = vmul.f32 %v311_v3, %v311_v3  ;;  %v38_v9 = vsel %vm37_vm0, %v311_v3, 0.0  ;;  %v59_v14 = vsel %vm37_vm0, %v34_v7, 0.0  ;;  %s238_s2 = scalar_lea.vmem %s188_s1, 256  ;;  %p243_p9 = scmp.lt.s32.totalorder %s188_s1, %s188_s1 }
  0x17   :  { %v39_v13 = vrot.slane %v38_v9, 4  ;;  %v71_v15 = vcombine.high %v67_v8, %v67_v8  ;;  %v53_v18 = vrot.slane %v52_v12, 4  ;;  %v60_v20 = vrot.slane %v59_v14, 4  ;;  %p239_p8 = scmp.ne.s32.totalorder %s188_s1, %s238_s2  ;;  %p244_p10 = scmp.lt.s32.totalorder %s238_s2, %s238_s2 }
  0x18   :  { %v45_v10 = vsel %vm37_vm0, %v33_v5, 0.0  ;;  %v70_v11 = vcombine.high %v66_v6, %v66_v6  ;;  %v74_v17 = vsel %vm37_vm0, %v66_v6, 0.0  ;;  %v88_v21 = vsel %vm37_vm0, %v67_v8, 0.0 }
  0x19   :  { %168 = vperm.xlu0 %205, %v165_v2   ;;  %v46_v16 = vrot.slane %v45_v10, 4  ;;  %v40_v22 = vadd.f32 %v39_v13, %v38_v9  ;;  %v75_v23 = vrot.slane %v74_v17, 4  ;;  %v95_v24 = vsel %vm37_vm0, %v71_v15, 0.0  ;;  %p245_p11 = por %p244_p10, %p243_p9 }
  0x1a   :  { %v81_v19 = vsel %vm37_vm0, %v70_v11, 0.0  ;;  %v54_v27 = vadd.f32 %v53_v18, %v52_v12  ;;  %v89_v28 = vrot.slane %v88_v21, 4  ;;  %v61_v29 = vadd.f32 %v60_v20, %v59_v14 }
  0x1b   :  { %v47_v25 = vadd.f32 %v46_v16, %v45_v10  ;;  %v82_v26 = vrot.slane %v81_v19, 4  ;;  %v96_v30 = vrot.slane %v95_v24, 4  ;;  %v41_v31 = vrot.slane %v40_v22, 2  ;;  %p246_p12 = pnand %p245_p11, %p239_p8 }
  0x1c   :  { %v76_v32 = vadd.f32 %v75_v23, %v74_v17  ;;  %v55_v35 = vrot.slane %v54_v27, 2  ;;  %v90_v36 = vadd.f32 %v89_v28, %v88_v21  ;;  %v62_v37 = vrot.slane %v61_v29, 2 }
  0x1d   :  { %v48_v33 = vrot.slane %v47_v25, 2  ;;  %v83_v34 = vadd.f32 %v82_v26, %v81_v19  ;;  %v97_v38 = vadd.f32 %v96_v30, %v95_v24  ;;  %v42_v39 = vadd.f32 %v41_v31, %v40_v22 }
  0x1e   :  { %v77_v40 = vrot.slane %v76_v32, 2  ;;  %v56_v43 = vadd.f32 %v55_v35, %v54_v27  ;;  %v91_v44 = vrot.slane %v90_v36, 2  ;;  %v63_v45 = vadd.f32 %v62_v37, %v61_v29 }
  0x1f   :  { %v49_v41 = vadd.f32 %v48_v33, %v47_v25  ;;  %v84_v42 = vrot.slane %v83_v34, 2  ;;  %v98_v46 = vrot.slane %v97_v38, 2  ;;  %v43_v47 = vrot.slane %v42_v39, 1 }
  0x20   :  { %v78_v48 = vadd.f32 %v77_v40, %v76_v32  ;;  %v57_v51 = vrot.slane %v56_v43, 1  ;;  %v92_v52 = vadd.f32 %v91_v44, %v90_v36  ;;  %v64_v53 = vrot.slane %v63_v45, 1 }
  0x21   :  { %v50_v49 = vrot.slane %v49_v41, 1  ;;  %v85_v50 = vadd.f32 %v84_v42, %v83_v34  ;;  %v99_v54 = vadd.f32 %v98_v46, %v97_v38  ;;  %v44_v55 = vadd.f32 %v43_v47, %v42_v39 }
  0x22   :  { %v79_v56 = vrot.slane %v78_v48, 1  ;;  %v58_v59 = vadd.f32 %v57_v51, %v56_v43  ;;  %v93_v60 = vrot.slane %v92_v52, 1  ;;  %v65_v61 = vadd.f32 %v64_v53, %v63_v45 }
  0x23   :  { %v51_v57 = vadd.f32 %v50_v49, %v49_v41  ;;  %v86_v58 = vrot.slane %v85_v50, 1  ;;  %v100_v62 = vrot.slane %v99_v54, 1  ;;  %v102_v0 = vmul.f32 0.25, %v44_v55 }
  0x24   :  { %v80_v63 = vadd.f32 %v79_v56, %v78_v48  ;;  %v94_v5 = vadd.f32 %v93_v60, %v92_v52  ;;  %v104_v6 = vmul.f32 0.25, %v58_v59  ;;  %v105_v8 = vmul.f32 0.25, %v65_v61 }
  0x25   :  { %v87_v1 = vadd.f32 %v86_v58, %v85_v50  ;;  %v103_v2 = vmul.f32 0.25, %v51_v57  ;;  %v101_v7 = vadd.f32 %v100_v62, %v99_v54  ;;  %v110_v10 = vmul.f32 %v102_v0, %v102_v0 }
  0x26   :  { %v106_v9 = vmul.f32 0.25, %v80_v63  ;;  %v108_v13 = vmul.f32 0.25, %v94_v5  ;;  %v112_v14 = vmul.f32 %v104_v6, %v104_v6  ;;  %v113_v16 = vmul.f32 %v105_v8, %v105_v8 }
  0x27   :  { %v107_v11 = vmul.f32 0.25, %v87_v1  ;;  %v111_v12 = vmul.f32 %v103_v2, %v103_v2  ;;  %v109_v15 = vmul.f32 0.25, %v101_v7  ;;  %v268_v29 = vmov 839922192  }
  0x28   :  { %v114_v17 = vsub.f32 %v106_v9, %v110_v10  ;;  %v116_v19 = vsub.f32 %v108_v13, %v112_v14  ;;  %v156_v30 = vunpack.c.l.s4 %v268_v29  ;;  %v158_v31 = vlaneseq }
  0x29   :  { %v115_v18 = vsub.f32 %v107_v11, %v111_v12  ;;  %v117_v20 = vsub.f32 %v109_v15, %v113_v16  ;;  %v134_v37 = vcombine.low %v102_v0, %v103_v2  ;;  %v135_v38 = vcombine.low %v104_v6, %v105_v8 }
  0x2a   :  { %v118_v21 = vmax.f32 %v114_v17, 0.0  ;;  %v120_v23 = vmax.f32 %v116_v19, 0.0  ;;  %v157_v34 = vunpack.c.0.s8 %v156_v30  ;;  %v159_v35 = vshrl.u32 %v158_v31, 7 }
  0x2b   :  { %v119_v22 = vmax.f32 %v115_v18, 0.0  ;;  %v121_v24 = vmax.f32 %v117_v20, 0.0  ;;  %v138_v41 = vsub.f32 %v311_v3, %v134_v37  ;;  %v139_v42 = vsub.f32 %v313_v4, %v135_v38 }
  0x2c   :  { %v122_v25 = vadd.f32 1e-05, %v118_v21  ;;  %v124_v27 = vadd.f32 1e-05, %v120_v23  ;;  %v160_v40 = vsub.s32 %v157_v34, %v159_v35 }
  0x2d   :  { %v123_v26 = vadd.f32 1e-05, %v119_v22  ;;  %v125_v28 = vadd.f32 1e-05, %v121_v24 }
  0x2e   :  { %208 = vrsqrt.f32 %v122_v25 }
  0x2f   :  { %210 = vrsqrt.f32 %v123_v26 }
  0x30   :  { %212 = vrsqrt.f32 %v124_v27 }
  0x31   :  { %214 = vrsqrt.f32 %v125_v28 }
  0x38   :  { %v209_v32 = vpop.eup %208 }
  0x39   :  { %v211_v33 = vpop.eup %210 }
  0x3a   :  { %v213_v36 = vpop.eup %212  ;;  %v144_v43 = vcombine.low %v209_v32, %v211_v33 }
  0x3b   :  { %v215_v39 = vpop.eup %214 }
  0x3c   :  { %v145_v44 = vcombine.low %v213_v36, %v215_v39  ;;  %v148_v46 = vmul.f32 %v144_v43, %v138_v41 }
  0x3e   :  { %v149_v47 = vmul.f32 %v145_v44, %v139_v42 }
  0x94   :  { %v154_v45 = vpop.permute.xlu0 %153 }
  0x95   :  { %v161_v48 = vrot.slane %v154_v45, %v160_v40 }
  0x97   :  { %v163_v50 = vmul.f32 %v161_v48, %v148_v46  ;;  %v164_v51 = vmul.f32 %v161_v48, %v149_v47 }
  0x98   :  { %v169_v49 = vpop.permute.xlu0 %168 }
  0x99   :  { %v176_v52 = vrot.slane %v169_v49, %v160_v40 }
  0x9b   :  { %v178_v53 = vadd.f32 %v176_v52, %v163_v50  ;;  %v179_v54 = vadd.f32 %v176_v52, %v164_v51 }
  0x9d   :  { %180 = vst [vmem:[#allocation5] sm:$0xff] %v178_v53  ;;  %181 = vst [vmem:[#allocation5 + $0x8] sm:$0xff] %v179_v54 }
  0x9e   :  { %249 = shalt.err (!%p246_p12)
}
  0x9f   :  { %s250_s5 = scalar_lea.hbm %s353_s3, 256 }
  0xa0   :  { %p251_p13 = scmp.ne.s32.totalorder %s353_s3, %s250_s5  ;;  %p254_p0 = scmp.lt.u32.totalorder %s250_s5, %s353_s3 }
  0xa2   :  { %p256_p1 = pnand %p254_p0, %p251_p13 }
  0xa4   :  { %259 = shalt.err (!%p256_p1)
}
  0xa5   :  { %193 = dma.vmem_to_hbm [thread:$0]  %s188_s1, 256, %s353_s3, [#allocation4], %s265_s22, %s265_s22, %s266_s23  }
  0xa6   :  { %262 = dma.done.wait [#allocation4], 256  }
  0xa7   :  { %263 = vsyncadd [#allocation4], 4294967040 }
  0xa8   :  { %197 = vsyncpa [#allocation3], 1 }
  0xa9   :  { %198 = vsyncpa [#allocation4], 1 }

</bundles_post_ra>
